<compile_context>
chip_gen: v6e
topology: v6e:2x2x1
jax: 0.10.0
libtpu: 0.0.40
codegen_flags: <defaults>
</compile_context>

<pallas_src>
import jax
import jax.numpy as jnp
from jax.experimental import pallas as pl
from jax.experimental.pallas import tpu as pltpu


# ----------------------------- Pallas kernel --------------------------------

def _mlp_fuse_kernel(x_ref, w1_ref, b1_ref, w2_ref, b2_ref, o_ref):
    """Fused fc1 + bias + ReLU6 + fc2 + bias on one row-tile.

    x_ref : (bm, Cin)   bf16 (or f32)
    w1_ref: (Cin, Chid) bf16 (or f32)
    b1_ref: (1, Chid)   f32
    w2_ref: (Chid, Cout) bf16 (or f32)
    b2_ref: (1, Cout)   f32
    o_ref : (bm, Cout)  f32
    """
    x = x_ref[...]
    # fc1: MXU matmul with f32 accumulation, bias folded into the epilogue.
    h = jnp.dot(x, w1_ref[...], preferred_element_type=jnp.float32)
    h = h + b1_ref[...]
    # ReLU6 (elementwise, stays in VMEM/vregs).
    h = jnp.minimum(jnp.maximum(h, 0.0), 6.0)
    # fc2: cast hidden back to the MXU operand dtype, accumulate in f32.
    out = jnp.dot(h.astype(w2_ref.dtype), w2_ref[...],
                  preferred_element_type=jnp.float32)
    out = out + b2_ref[...]
    o_ref[...] = out.astype(o_ref.dtype)


def mlp_fuse_flat(x2d, w1, b1, w2, b2, *, block_rows=512):
    """x2d: (N, Cin); returns (N, Cout) f32. Row-tiled, fully fused MLP."""
    N, Cin = x2d.shape
    Chid = w1.shape[1]
    Cout = w2.shape[1]

    # Row tile: multiple of 8 sublanes, capped by block_rows and by N.
    bm = min(block_rows, max(8, N))
    bm = ((bm + 7) // 8) * 8
    n_pad = (-N) % bm
    if n_pad:
        x2d = jnp.pad(x2d, ((0, n_pad), (0, 0)))
    Np = x2d.shape[0]
    grid = (Np // bm,)

    out = pl.pallas_call(
        _mlp_fuse_kernel,
        out_shape=jax.ShapeDtypeStruct((Np, Cout), jnp.float32),
        grid=grid,
        in_specs=[
            pl.BlockSpec((bm, Cin), lambda i: (i, 0)),     # streamed row tiles
            pl.BlockSpec((Cin, Chid), lambda i: (0, 0)),   # resident weights
            pl.BlockSpec((1, Chid), lambda i: (0, 0)),     # resident bias
            pl.BlockSpec((Chid, Cout), lambda i: (0, 0)),
            pl.BlockSpec((1, Cout), lambda i: (0, 0)),
        ],
        out_specs=pl.BlockSpec((bm, Cout), lambda i: (i, 0)),
        compiler_params=pltpu.CompilerParams(
            dimension_semantics=("parallel",),   # row axis shards across TCs (v7x)
            vmem_limit_bytes=32 * 1024 * 1024,   # explicit budget, safe on 64 MiB v7x
        ),
    )(x2d, w1, b1, w2, b2)

    if n_pad:
        out = out[:N]
    return out


# ------------------------------- wrapper -------------------------------------

def mlp_fuse_forward(x_nchw, params, *, compute_dtype=jnp.bfloat16,
                     block_rows=512):
    """NCHW in -> NCHW out, matching Mlp_fuse.forward (inference, drop=0)."""
    B, C, H, W = x_nchw.shape
    # 1x1 convs == per-pixel matmul: flatten spatial dims, channels last (lane dim).
    x = jnp.transpose(x_nchw, (0, 2, 3, 1)).reshape(B * H * W, C)

    # bf16 operands for the MXU (f32 accumulation inside the kernel); biases stay f32.
    x = x.astype(compute_dtype)
    w1 = params['fc1_w'].astype(compute_dtype)
    w2 = params['fc2_w'].astype(compute_dtype)
    b1 = params['fc1_b'].reshape(1, -1).astype(jnp.float32)
    b2 = params['fc2_b'].reshape(1, -1).astype(jnp.float32)

    # TODO(synk): nn.Dropout is identity at inference / drop=0.0, so it is omitted.
    out = mlp_fuse_flat(x, w1, b1, w2, b2, block_rows=block_rows)

    Cout = out.shape[-1]
    out = out.reshape(B, H, W, Cout)
    return jnp.transpose(out, (0, 3, 1, 2))   # back to NCHW


def init_params(key, in_features, hidden_features=None, out_features=None):
    out_features = out_features or in_features
    hidden_features = hidden_features or in_features
    k1, k2, k3, k4 = jax.random.split(key, 4)
    std = 0.02
    # NOTE: weights stored as (Cin, Cout); loading PyTorch Conv2d weights
    # (Cout, Cin, 1, 1) requires a transpose.
    return {
        'fc1_w': std * jax.random.normal(k1, (in_features, hidden_features), jnp.float32),
        'fc1_b': std * jax.random.normal(k2, (hidden_features,), jnp.float32),
        'fc2_w': std * jax.random.normal(k3, (hidden_features, out_features), jnp.float32),
        'fc2_b': std * jax.random.normal(k4, (out_features,), jnp.float32),
    }


def _reference_forward(x_nchw, params):
    # Plain-JAX reference (same bf16 operand rounding as the kernel path).
    B, C, H, W = x_nchw.shape
    x = jnp.transpose(x_nchw, (0, 2, 3, 1)).reshape(B * H * W, C).astype(jnp.bfloat16)
    w1 = params['fc1_w'].astype(jnp.bfloat16)
    w2 = params['fc2_w'].astype(jnp.bfloat16)
    h = jnp.dot(x, w1, preferred_element_type=jnp.float32) + params['fc1_b']
    h = jnp.minimum(jnp.maximum(h, 0.0), 6.0)
    o = jnp.dot(h.astype(jnp.bfloat16), w2,
                preferred_element_type=jnp.float32) + params['fc2_b']
    o = o.reshape(B, H, W, -1)
    return jnp.transpose(o, (0, 3, 1, 2))


# ---------------------------------- main --------------------------------------

if __name__ == "__main__":
    key = jax.random.PRNGKey(0)
    B, C, H, W = 2, 32, 16, 16          # in_features = 32
    HIDDEN = 128                         # hidden_features
    OUT = C                              # out_features defaults to in_features

    kx, kp = jax.random.split(key, 2)
    x = jax.random.normal(kx, (B, C, H, W), jnp.float32)
    params = init_params(kp, in_features=C, hidden_features=HIDDEN, out_features=OUT)

    out = mlp_fuse_forward(x, params, block_rows=256)   # grid=(2,), 256-row tiles
    out = jax.block_until_ready(out)

    assert out.shape == (B, OUT, H, W), out.shape
    ref = jax.block_until_ready(_reference_forward(x, params))
    assert bool(jnp.allclose(out, ref, atol=2e-2, rtol=2e-2)), \
        float(jnp.max(jnp.abs(out - ref)))

    print("KERNEL_OK")
</pallas_src>

<mosaic_0001>
module attributes {stable_mosaic.version = 11 : i64} {
  func.func @_mlp_fuse_kernel(%arg0: i32, %arg1: memref<256x32xbf16, #tpu.memory_space<vmem>>, %arg2: memref<32x128xbf16, #tpu.memory_space<vmem>>, %arg3: memref<1x128xf32, #tpu.memory_space<vmem>>, %arg4: memref<128x32xbf16, #tpu.memory_space<vmem>>, %arg5: memref<1x32xf32, #tpu.memory_space<vmem>>, %arg6: memref<256x32xf32, #tpu.memory_space<vmem>>) attributes {dimension_semantics = [#tpu.dimension_semantics<parallel>], iteration_bounds = array<i64: 2>, scalar_prefetch = 0 : i64, scratch_operands = 0 : i64, tpu.core_type = #tpu.core_type<tc>, window_params = [{transform_indices = @transform_0, window_bounds = array<i64: 256, 32>}, {pipeline_mode = #tpu.pipeline_mode<synchronous>, transform_indices = @transform_1, window_bounds = array<i64: 32, 128>}, {pipeline_mode = #tpu.pipeline_mode<synchronous>, transform_indices = @transform_2, window_bounds = array<i64: 1, 128>}, {pipeline_mode = #tpu.pipeline_mode<synchronous>, transform_indices = @transform_3, window_bounds = array<i64: 128, 32>}, {pipeline_mode = #tpu.pipeline_mode<synchronous>, transform_indices = @transform_4, window_bounds = array<i64: 1, 32>}, {transform_indices = @transform_5, window_bounds = array<i64: 256, 32>}]} {
    %c0 = arith.constant 0 : index
    %c0_0 = arith.constant 0 : index
    %0 = vector.load %arg1[%c0, %c0_0] : memref<256x32xbf16, #tpu.memory_space<vmem>>, vector<256x32xbf16>
    %c0_1 = arith.constant 0 : index
    %c0_2 = arith.constant 0 : index
    %1 = vector.load %arg2[%c0_1, %c0_2] : memref<32x128xbf16, #tpu.memory_space<vmem>>, vector<32x128xbf16>
    %cst = arith.constant dense<0.000000e+00> : vector<256x128xf32>
    %2 = tpu.matmul %0, %1, %cst {dimension_numbers = #tpu.dot_dimension_numbers<[1], [0], [0], [1], [0, 0, 1, 1], [], []>} : vector<256x32xbf16>, vector<32x128xbf16>, vector<256x128xf32> -> vector<256x128xf32>
    %c0_3 = arith.constant 0 : index
    %c0_4 = arith.constant 0 : index
    %3 = vector.load %arg3[%c0_3, %c0_4] : memref<1x128xf32, #tpu.memory_space<vmem>>, vector<1x128xf32>
    %4 = vector.broadcast %3 : vector<1x128xf32> to vector<256x128xf32>
    %5 = arith.addf %2, %4 : vector<256x128xf32>
    %cst_5 = arith.constant 0.000000e+00 : f32
    %6 = vector.broadcast %cst_5 : f32 to vector<256x128xf32>
    %7 = arith.maximumf %5, %6 : vector<256x128xf32>
    %cst_6 = arith.constant 6.000000e+00 : f32
    %8 = vector.broadcast %cst_6 : f32 to vector<256x128xf32>
    %9 = arith.minimumf %7, %8 : vector<256x128xf32>
    %10 = arith.truncf %9 : vector<256x128xf32> to vector<256x128xbf16>
    %c0_7 = arith.constant 0 : index
    %c0_8 = arith.constant 0 : index
    %11 = vector.load %arg4[%c0_7, %c0_8] : memref<128x32xbf16, #tpu.memory_space<vmem>>, vector<128x32xbf16>
    %cst_9 = arith.constant dense<0.000000e+00> : vector<256x32xf32>
    %12 = tpu.matmul %10, %11, %cst_9 {dimension_numbers = #tpu.dot_dimension_numbers<[1], [0], [0], [1], [0, 0, 1, 1], [], []>} : vector<256x128xbf16>, vector<128x32xbf16>, vector<256x32xf32> -> vector<256x32xf32>
    %c0_10 = arith.constant 0 : index
    %c0_11 = arith.constant 0 : index
    %13 = vector.load %arg5[%c0_10, %c0_11] : memref<1x32xf32, #tpu.memory_space<vmem>>, vector<1x32xf32>
    %14 = vector.broadcast %13 : vector<1x32xf32> to vector<256x32xf32>
    %15 = arith.addf %12, %14 : vector<256x32xf32>
    %c0_12 = arith.constant 0 : index
    %c0_13 = arith.constant 0 : index
    %16 = vector.load %arg6[%c0_12, %c0_13] : memref<256x32xf32, #tpu.memory_space<vmem>>, vector<256x32xf32>
    tpu.vector_store %arg6[%c0_12, %c0_13], %15 {strides = array<i32>} : memref<256x32xf32, #tpu.memory_space<vmem>>, vector<256x32xf32>,
    return
  }
  func.func @transform_0(%arg0: i32) -> (i32, i32) {
    %c0_i32 = arith.constant 0 : i32
    %c0_i32_0 = arith.constant 0 : i32
    return %arg0, %c0_i32 : i32, i32
  }
  func.func @transform_1(%arg0: i32) -> (i32, i32) {
    %c0_i32 = arith.constant 0 : i32
    %c0_i32_0 = arith.constant 0 : i32
    %c0_i32_1 = arith.constant 0 : i32
    return %c0_i32, %c0_i32_0 : i32, i32
  }
  func.func @transform_2(%arg0: i32) -> (i32, i32) {
    %c0_i32 = arith.constant 0 : i32
    %c0_i32_0 = arith.constant 0 : i32
    %c0_i32_1 = arith.constant 0 : i32
    return %c0_i32, %c0_i32_0 : i32, i32
  }
  func.func @transform_3(%arg0: i32) -> (i32, i32) {
    %c0_i32 = arith.constant 0 : i32
    %c0_i32_0 = arith.constant 0 : i32
    %c0_i32_1 = arith.constant 0 : i32
    return %c0_i32, %c0_i32_0 : i32, i32
  }
  func.func @transform_4(%arg0: i32) -> (i32, i32) {
    %c0_i32 = arith.constant 0 : i32
    %c0_i32_0 = arith.constant 0 : i32
    %c0_i32_1 = arith.constant 0 : i32
    return %c0_i32, %c0_i32_0 : i32, i32
  }
  func.func @transform_5(%arg0: i32) -> (i32, i32) {
    %c0_i32 = arith.constant 0 : i32
    %c0_i32_0 = arith.constant 0 : i32
    return %arg0, %c0_i32 : i32, i32
  }
}

</mosaic_0001>

<bundles_post_ra>
// kernel: tpu_custom_call.1
= control target key start
LH: loop header
LB: loop body
LE: loop exit
PB: predicated region body
PF: predicated region fallthrough
CT: control target
= control target key end

     0   :  { %s1243_s18 = smov 0   ;;  %s1468_s0 = inlined_call_operand.vmem [shape: bf16[512,32], index: 0, kind: input, shape index: {}]   ;;  %s1469_s1 = inlined_call_operand.vmem [shape: bf16[32,128], index: 1, kind: input, shape index: {}]   ;;  %s1470_s2 = inlined_call_operand.vmem [shape: f32[1,128], index: 2, kind: input, shape index: {}]   ;;  %s1471_s3 = inlined_call_operand.vmem [shape: bf16[128,32], index: 3, kind: input, shape index: {}]   ;;  %s1472_s4 = inlined_call_operand.vmem [shape: f32[1,32], index: 4, kind: input, shape index: {}]   ;;  %s1473_s5 = inlined_call_operand.vmem [shape: f32[512,32], index: 5, kind: output, shape index: {}]  }
   0x1 LB: > { %s974_s19 = sadd.s32 4294967295, %s1211_s18   ;;  %p978_p0 = scmp.ge.s32.totalorder %s1211_s18, 1  ;;  %s1211_s18 = sphi %s1243_s18, %s15_s18  }
   0x2   : > { %p188_p1 = scmp.lt.s32.totalorder %s1211_s18, 3 }
   0x4   : > { %p189_p2 = pnand %p978_p0, %p188_p1 }
   0x5   : > { %s979_s22 = sshll.u32 (!%p189_p2), %s974_s19, 5 }
   0x6   : > { %192 = sbr.rel (%p189_p2) target bundleno = 486 (0x1e6), region = 40  ;;  %p217_p3 = scmp.lt.s32.totalorder (!%p189_p2), %s979_s22, 63 }
   0xb   : > { %v1179_v0 = vld [vmem:[%s1469_s1 + $0x8] sm:$0xff]   ;;  %v1180_v1 = vld [vmem:[%s1469_s1] sm:$0xff]   ;;  %v1197_v2 = vld [vmem:[%s1471_s3 + $0x38] sm:$0xff]   ;;  %s1475_s22 = smov (!%p217_p3, %s979_s22), 63  ;;  %vm364_vm0 = vcmask 261120  }
   0xc   : > { %1071 = vmatprep.subr.bf16.mxu0 %v1179_v0  ;;  %v1198_v3 = vld [vmem:[%s1471_s3 + $0x30] sm:$0xff]   ;;  %1155 = vmatprep.subr.bf16.mxu1 %v1197_v2  ;;  %s980_s29 = sshll.u32 %s1475_s22, 2  ;;  %v1199_v4 = vld [vmem:[%s1471_s3 + $0x28] sm:$0xff]   ;;  %v1200_v8 = vld [vmem:[%s1471_s3 + $0x20] sm:$0xff]   ;;  %s982_s24 = sshll.u32 %s1475_s22, 3 }
   0xd   : > { %1072 = vmatpush3.bf16.msra.mxu0 %v1179_v0  ;;  %1163 = vmatpush3.bf16.msra.mxu1 %v1197_v2  ;;  %s1269_s7 = scalar_lea.vmem %s1468_s0, %s980_s29  ;;  %v1201_v22 = vld [vmem:[%s1471_s3 + $0x18] sm:$0xff]   ;;  %v1202_v23 = vld [vmem:[%s1471_s3 + $0x10] sm:$0xff]   ;;  %v1203_v24 = vld [vmem:[%s1471_s3 + $0x8] sm:$0xff]   ;;  %s1367_s29 = scalar_lea.vmem %s1473_s5, %s982_s24 }
   0xe   : > { %1073 = vmatprep.subr.bf16.mxu0 %v1180_v1  ;;  %1156 = vmatprep.subr.bf16.mxu1 %v1198_v3  ;;  %v1181_v5 = vld [vmem:[%s1269_s7] sm:$0xff]   ;;  %v1182_v6 = vld [vmem:[%s1269_s7 + $0x8] sm:$0xff]   ;;  %v1183_v7 = vld [vmem:[%s1269_s7 + $0x10] sm:$0xff]  }
   0xf   : > { %1075 = vmatprep.mubr.msk.bf16.mxu0 %vm364_vm0, %v1181_v5  ;;  %v1184_v9 = vld [vmem:[%s1269_s7 + $0x18] sm:$0xff]   ;;  %v1185_v10 = vld [vmem:[%s1269_s7 + $0x20] sm:$0xff]   ;;  %v1186_v11 = vld [vmem:[%s1269_s7 + $0x28] sm:$0xff]  }
  0x10   : > { %v1187_v12 = vld [vmem:[%s1269_s7 + $0x30] sm:$0xff]   ;;  %v1188_v13 = vld [vmem:[%s1269_s7 + $0x38] sm:$0xff]   ;;  %v1189_v14 = vld [vmem:[%s1269_s7 + $0x40] sm:$0xff]  }
  0x11   : > { %1074 = vmatpush3.bf16.msra.mxu0 %v1180_v1  ;;  %1164 = vmatpush3.bf16.msra.mxu1 %v1198_v3  ;;  %v1190_v15 = vld [vmem:[%s1269_s7 + $0x48] sm:$0xff]   ;;  %v1191_v16 = vld [vmem:[%s1269_s7 + $0x50] sm:$0xff]   ;;  %v1192_v17 = vld [vmem:[%s1269_s7 + $0x58] sm:$0xff]  }
  0x12   : > { %1107 = vmatprep.subr.bf16.mxu0 %v1197_v2  ;;  %1157 = vmatprep.subr.bf16.mxu1 %v1199_v4  ;;  %v1193_v18 = vld [vmem:[%s1269_s7 + $0x60] sm:$0xff]   ;;  %v1194_v19 = vld [vmem:[%s1269_s7 + $0x68] sm:$0xff]   ;;  %v1195_v20 = vld [vmem:[%s1269_s7 + $0x70] sm:$0xff]  }
  0x13   : > { %v1196_v21 = vld [vmem:[%s1269_s7 + $0x78] sm:$0xff]   ;;  %v1204_v25 = vld [vmem:[%s1471_s3] sm:$0xff]  }
  0x14   : > { %1076 = vmatmul.mubr.msk.bf16.vlgmr.msra.gmra.mxu0 %vm364_vm0, %v1182_v6  ;;  %v1324_v27 = vld [vmem:[%s1470_s2] ss:$0 sm:$0xff] }
  0x15   : > { %1079 = vmatprep.mubr.msk.bf16.mxu0 %vm364_vm0, %v1183_v7  ;;  %1108 = vmatpush3.bf16.msra.mxu0 %v1197_v2 }
  0x16   : > { %1109 = vmatprep.subr.bf16.mxu0 %v1198_v3  ;;  %1165 = vmatpush3.bf16.msra.mxu1 %v1199_v4 }
  0x17   : > { %1158 = vmatprep.subr.bf16.mxu1 %v1200_v8 }
  0x19   : > { %1110 = vmatpush3.bf16.msra.mxu0 %v1198_v3 }
  0x1a   : > { %1111 = vmatprep.subr.bf16.mxu0 %v1199_v4  ;;  %1166 = vmatpush3.bf16.msra.mxu1 %v1200_v8 }
  0x1b   : > { %1159 = vmatprep.subr.bf16.mxu1 %v1201_v22 }
  0x1c   : > { %1080 = vmatmul.mubr.msk.bf16.gmra.mxu0 %vm364_vm0, %v1184_v9 }
  0x1d   : > { %1083 = vmatprep.mubr.msk.bf16.mxu0 %vm364_vm0, %v1185_v10  ;;  %1112 = vmatpush3.bf16.msra.mxu0 %v1199_v4 }
  0x1e   : > { %1113 = vmatprep.subr.bf16.mxu0 %v1200_v8  ;;  %1167 = vmatpush3.bf16.msra.mxu1 %v1201_v22 }
  0x1f   : > { %1160 = vmatprep.subr.bf16.mxu1 %v1202_v23 }
  0x21   : > { %1114 = vmatpush3.bf16.msra.mxu0 %v1200_v8 }
  0x22   : > { %1115 = vmatprep.subr.bf16.mxu0 %v1201_v22  ;;  %1168 = vmatpush3.bf16.msra.mxu1 %v1202_v23 }
  0x23   : > { %1161 = vmatprep.subr.bf16.mxu1 %v1203_v24 }
  0x24   : > { %1084 = vmatmul.mubr.msk.bf16.gmra.mxu0 %vm364_vm0, %v1186_v11 }
  0x25   : > { %1087 = vmatprep.mubr.msk.bf16.mxu0 %vm364_vm0, %v1187_v12  ;;  %1116 = vmatpush3.bf16.msra.mxu0 %v1201_v22 }
  0x26   : > { %1117 = vmatprep.subr.bf16.mxu0 %v1202_v23  ;;  %1169 = vmatpush3.bf16.msra.mxu1 %v1203_v24 }
  0x27   : > { %1162 = vmatprep.subr.bf16.mxu1 %v1204_v25 }
  0x29   : > { %1118 = vmatpush3.bf16.msra.mxu0 %v1202_v23 }
  0x2a   : > { %1119 = vmatprep.subr.bf16.mxu0 %v1203_v24  ;;  %1170 = vmatpush3.bf16.msra.mxu1 %v1204_v25 }
  0x2c   : > { %1088 = vmatmul.mubr.msk.bf16.gmra.mxu0 %vm364_vm0, %v1188_v13 }
  0x2d   : > { %1091 = vmatprep.mubr.msk.bf16.mxu0 %vm364_vm0, %v1189_v14  ;;  %1120 = vmatpush3.bf16.msra.mxu0 %v1203_v24 }
  0x2e   : > { %1121 = vmatprep.subr.bf16.mxu0 %v1204_v25 }
  0x31   : > { %1122 = vmatpush3.bf16.msra.mxu0 %v1204_v25 }
  0x34   : > { %1092 = vmatmul.mubr.msk.bf16.gmra.mxu0 %vm364_vm0, %v1190_v15 }
  0x35   : > { %1095 = vmatprep.mubr.msk.bf16.mxu0 %vm364_vm0, %v1191_v16 }
  0x3c   : > { %1096 = vmatmul.mubr.msk.bf16.gmra.mxu0 %vm364_vm0, %v1192_v17 }
  0x3d   : > { %1099 = vmatprep.mubr.msk.bf16.mxu0 %vm364_vm0, %v1193_v18 }
  0x44   : > { %1100 = vmatmul.mubr.msk.bf16.gmra.mxu0 %vm364_vm0, %v1194_v19 }
  0x45   : > { %1103 = vmatprep.mubr.msk.bf16.mxu0 %vm364_vm0, %v1195_v20 }
  0x4c   : > { %1104 = vmatmul.mubr.msk.bf16.gmra.mxu0 %vm364_vm0, %v1196_v21 }
  0xd4   : > { %v1077_v26 = vpop.f32.mrf.mxu0 }
  0xd5   : > { %v456_v30 = vadd.f32 %v1077_v26, %v1324_v27 }
  0xd6   : > { %v447_v28 = vpop.f32.mrf.mxu0 }
  0xd7   : > { %v448_v29 = vadd.f32 %v1324_v27, %v447_v28  ;;  %v576_v37 = vmax.f32 %v456_v30, 0.0 }
  0xd8   : > { %v1078_v31 = vpop.f32.mrf.mxu0 }
  0xd9   : > { %v459_v32 = vadd.f32 %v1078_v31, %v1324_v27  ;;  %v574_v34 = vmax.f32 %v448_v29, 0.0  ;;  %v608_v45 = vmin.f32 %v576_v37, 6.0 }
  0xda   : > { %v450_v33 = vpop.f32.mrf.mxu0 }
  0xdb   : > { %v577_v35 = vmax.f32 %v459_v32, 0.0  ;;  %v451_v36 = vadd.f32 %v1324_v27, %v450_v33  ;;  %v606_v42 = vmin.f32 %v574_v34, 6.0 }
  0xdc   : > { %v1081_v38 = vpop.f32.mrf.mxu0 }
  0xdd   : > { %v575_v39 = vmax.f32 %v451_v36, 0.0  ;;  %v609_v40 = vmin.f32 %v577_v35, 6.0  ;;  %v472_v46 = vadd.f32 %v1081_v38, %v1324_v27 }
  0xde   : > { %v463_v41 = vpop.f32.mrf.mxu0 }
  0xdf   : > { %v607_v43 = vmin.f32 %v575_v39, 6.0  ;;  %v464_v44 = vadd.f32 %v1324_v27, %v463_v41  ;;  %v639_v50 = vpack.c.bf16 %v609_v40, %v608_v45  ;;  %v580_v55 = vmax.f32 %v472_v46, 0.0 }
  0xe0   : > { %v1082_v47 = vpop.f32.mrf.mxu0 }
  0xe1   : > { %v638_v48 = vpack.c.bf16 %v607_v43, %v606_v42  ;;  %v475_v49 = vadd.f32 %v1082_v47, %v1324_v27  ;;  %v578_v52 = vmax.f32 %v464_v44, 0.0  ;;  %v612_v63 = vmin.f32 %v580_v55, 6.0 }
  0xe2   : > { %v466_v51 = vpop.f32.mrf.mxu0 }
  0xe3   : > { %v581_v53 = vmax.f32 %v475_v49, 0.0  ;;  %v467_v54 = vadd.f32 %v1324_v27, %v466_v51  ;;  %1123 = vmatprep.mubr.bf16.mxu0 %v638_v48  ;;  %v610_v60 = vmin.f32 %v578_v52, 6.0 }
  0xe4   : > { %v1085_v56 = vpop.f32.mrf.mxu0  ;;  %1124 = vmatmul.mubr.bf16.vlgmr.msra.gmra.mxu0 %v639_v50 }
  0xe5   : > { %v579_v57 = vmax.f32 %v467_v54, 0.0  ;;  %v613_v58 = vmin.f32 %v581_v53, 6.0  ;;  %v488_v0 = vadd.f32 %v1085_v56, %v1324_v27 }
  0xe6   : > { %v479_v59 = vpop.f32.mrf.mxu0 }
  0xe7   : > { %v611_v61 = vmin.f32 %v579_v57, 6.0  ;;  %v480_v62 = vadd.f32 %v1324_v27, %v479_v59  ;;  %v641_v4 = vpack.c.bf16 %v613_v58, %v612_v63  ;;  %v584_v9 = vmax.f32 %v488_v0, 0.0 }
  0xe8   : > { %v1086_v1 = vpop.f32.mrf.mxu0 }
  0xe9   : > { %v491_v2 = vadd.f32 %v1086_v1, %v1324_v27  ;;  %v640_v3 = vpack.c.bf16 %v611_v61, %v610_v60  ;;  %v582_v6 = vmax.f32 %v480_v62, 0.0  ;;  %v616_v17 = vmin.f32 %v584_v9, 6.0 }
  0xea   : > { %v482_v5 = vpop.f32.mrf.mxu0 }
  0xeb   : > { %v585_v7 = vmax.f32 %v491_v2, 0.0  ;;  %v483_v8 = vadd.f32 %v1324_v27, %v482_v5  ;;  %1127 = vmatprep.mubr.bf16.mxu1 %v640_v3  ;;  %v614_v14 = vmin.f32 %v582_v6, 6.0 }
  0xec   : > { %v1089_v10 = vpop.f32.mrf.mxu0  ;;  %1128 = vmatmul.mubr.bf16.vlgmr.msra.gmra.mxu1 %v641_v4 }
  0xed   : > { %v583_v11 = vmax.f32 %v483_v8, 0.0  ;;  %v617_v12 = vmin.f32 %v585_v7, 6.0  ;;  %v504_v18 = vadd.f32 %v1089_v10, %v1324_v27 }
  0xee   : > { %v495_v13 = vpop.f32.mrf.mxu0 }
  0xef   : > { %v615_v15 = vmin.f32 %v583_v11, 6.0  ;;  %v496_v16 = vadd.f32 %v1324_v27, %v495_v13  ;;  %v643_v22 = vpack.c.bf16 %v617_v12, %v616_v17  ;;  %v588_v28 = vmax.f32 %v504_v18, 0.0 }
  0xf0   : > { %v1090_v19 = vpop.f32.mrf.mxu0 }
  0xf1   : > { %v642_v20 = vpack.c.bf16 %v615_v15, %v614_v14  ;;  %v507_v21 = vadd.f32 %v1090_v19, %v1324_v27  ;;  %v586_v24 = vmax.f32 %v496_v16, 0.0  ;;  %v620_v36 = vmin.f32 %v588_v28, 6.0 }
  0xf2   : > { %v498_v23 = vpop.f32.mrf.mxu0 }
  0xf3   : > { %v589_v25 = vmax.f32 %v507_v21, 0.0  ;;  %v499_v26 = vadd.f32 %v1324_v27, %v498_v23  ;;  %1131 = vmatprep.mubr.bf16.mxu1 %v642_v20  ;;  %v618_v33 = vmin.f32 %v586_v24, 6.0 }
  0xf4   : > { %v1093_v29 = vpop.f32.mrf.mxu0  ;;  %1132 = vmatmul.mubr.bf16.gmra.mxu1 %v643_v22 }
  0xf5   : > { %v587_v30 = vmax.f32 %v499_v26, 0.0  ;;  %v621_v31 = vmin.f32 %v589_v25, 6.0  ;;  %v520_v37 = vadd.f32 %v1093_v29, %v1324_v27 }
  0xf6   : > { %v511_v32 = vpop.f32.mrf.mxu0 }
  0xf7   : > { %v619_v34 = vmin.f32 %v587_v30, 6.0  ;;  %v512_v35 = vadd.f32 %v1324_v27, %v511_v32  ;;  %v645_v41 = vpack.c.bf16 %v621_v31, %v620_v36  ;;  %v592_v46 = vmax.f32 %v520_v37, 0.0 }
  0xf8   : > { %v1094_v38 = vpop.f32.mrf.mxu0 }
  0xf9   : > { %v644_v39 = vpack.c.bf16 %v619_v34, %v618_v33  ;;  %v523_v40 = vadd.f32 %v1094_v38, %v1324_v27  ;;  %v590_v43 = vmax.f32 %v512_v35, 0.0  ;;  %v624_v54 = vmin.f32 %v592_v46, 6.0 }
  0xfa   : > { %v514_v42 = vpop.f32.mrf.mxu0 }
  0xfb   : > { %v593_v44 = vmax.f32 %v523_v40, 0.0  ;;  %v515_v45 = vadd.f32 %v1324_v27, %v514_v42  ;;  %1135 = vmatprep.mubr.bf16.mxu1 %v644_v39  ;;  %v622_v51 = vmin.f32 %v590_v43, 6.0 }
  0xfc   : > { %v1097_v47 = vpop.f32.mrf.mxu0  ;;  %1136 = vmatmul.mubr.bf16.gmra.mxu1 %v645_v41 }
  0xfd   : > { %v591_v48 = vmax.f32 %v515_v45, 0.0  ;;  %v625_v49 = vmin.f32 %v593_v44, 6.0  ;;  %v536_v55 = vadd.f32 %v1097_v47, %v1324_v27  ;;  %v1362_v45 = vld [vmem:[%s1472_s4] ss:$0 sm:$0xff] }
  0xfe   : > { %v527_v50 = vpop.f32.mrf.mxu0 }
  0xff   : > { %v623_v52 = vmin.f32 %v591_v48, 6.0  ;;  %v528_v53 = vadd.f32 %v1324_v27, %v527_v50  ;;  %v647_v59 = vpack.c.bf16 %v625_v49, %v624_v54  ;;  %v596_v0 = vmax.f32 %v536_v55, 0.0 }
 0x100   : > { %v1098_v56 = vpop.f32.mrf.mxu0 }
 0x101   : > { %v646_v57 = vpack.c.bf16 %v623_v52, %v622_v51  ;;  %v539_v58 = vadd.f32 %v1098_v56, %v1324_v27  ;;  %v594_v61 = vmax.f32 %v528_v53, 0.0  ;;  %v628_v8 = vmin.f32 %v596_v0, 6.0 }
 0x102   : > { %v530_v60 = vpop.f32.mrf.mxu0 }
 0x103   : > { %v597_v62 = vmax.f32 %v539_v58, 0.0  ;;  %v531_v63 = vadd.f32 %v1324_v27, %v530_v60  ;;  %1139 = vmatprep.mubr.bf16.mxu1 %v646_v57  ;;  %v626_v5 = vmin.f32 %v594_v61, 6.0 }
 0x104   : > { %v1101_v1 = vpop.f32.mrf.mxu0  ;;  %1140 = vmatmul.mubr.bf16.gmra.mxu1 %v647_v59 }
 0x105   : > { %v595_v2 = vmax.f32 %v531_v63, 0.0  ;;  %v629_v3 = vmin.f32 %v597_v62, 6.0  ;;  %v552_v9 = vadd.f32 %v1101_v1, %v1324_v27 }
 0x106   : > { %v543_v4 = vpop.f32.mrf.mxu0 }
 0x107   : > { %v627_v6 = vmin.f32 %v595_v2, 6.0  ;;  %v544_v7 = vadd.f32 %v1324_v27, %v543_v4  ;;  %v649_v13 = vpack.c.bf16 %v629_v3, %v628_v8  ;;  %v600_v18 = vmax.f32 %v552_v9, 0.0 }
 0x108   : > { %v1102_v10 = vpop.f32.mrf.mxu0 }
 0x109   : > { %v648_v11 = vpack.c.bf16 %v627_v6, %v626_v5  ;;  %v555_v12 = vadd.f32 %v1102_v10, %v1324_v27  ;;  %v598_v15 = vmax.f32 %v544_v7, 0.0  ;;  %v632_v26 = vmin.f32 %v600_v18, 6.0 }
 0x10a   : > { %v546_v14 = vpop.f32.mrf.mxu0 }
 0x10b   : > { %v601_v16 = vmax.f32 %v555_v12, 0.0  ;;  %v547_v17 = vadd.f32 %v1324_v27, %v546_v14  ;;  %1143 = vmatprep.mubr.bf16.mxu1 %v648_v11  ;;  %v630_v23 = vmin.f32 %v598_v15, 6.0 }
 0x10c   : > { %v1105_v19 = vpop.f32.mrf.mxu0  ;;  %1144 = vmatmul.mubr.bf16.gmra.mxu1 %v649_v13 }
 0x10d   : > { %v599_v20 = vmax.f32 %v547_v17, 0.0  ;;  %v633_v21 = vmin.f32 %v601_v16, 6.0  ;;  %v568_v28 = vadd.f32 %v1105_v19, %v1324_v27 }
 0x10e   : > { %v559_v22 = vpop.f32.mrf.mxu0 }
 0x10f   : > { %v631_v24 = vmin.f32 %v599_v20, 6.0  ;;  %v560_v25 = vadd.f32 %v1324_v27, %v559_v22  ;;  %v651_v32 = vpack.c.bf16 %v633_v21, %v632_v26  ;;  %v604_v37 = vmax.f32 %v568_v28, 0.0 }
 0x110   : > { %v1106_v29 = vpop.f32.mrf.mxu0 }
 0x111   : > { %v650_v30 = vpack.c.bf16 %v631_v24, %v630_v23  ;;  %v571_v31 = vadd.f32 %v1106_v29, %v1324_v27  ;;  %v602_v34 = vmax.f32 %v560_v25, 0.0  ;;  %v636_v42 = vmin.f32 %v604_v37, 6.0 }
 0x112   : > { %v562_v33 = vpop.f32.mrf.mxu0 }
 0x113   : > { %v605_v35 = vmax.f32 %v571_v31, 0.0  ;;  %v563_v36 = vadd.f32 %v1324_v27, %v562_v33  ;;  %1147 = vmatprep.mubr.bf16.mxu1 %v650_v30  ;;  %v634_v40 = vmin.f32 %v602_v34, 6.0 }
 0x114   : > { %1148 = vmatmul.mubr.bf16.gmra.mxu1 %v651_v32 }
 0x115   : > { %v603_v38 = vmax.f32 %v563_v36, 0.0  ;;  %v637_v39 = vmin.f32 %v605_v35, 6.0 }
 0x117   : > { %v635_v41 = vmin.f32 %v603_v38, 6.0  ;;  %v653_v44 = vpack.c.bf16 %v637_v39, %v636_v42 }
 0x119   : > { %v652_v43 = vpack.c.bf16 %v635_v41, %v634_v40 }
 0x11b   : > { %1151 = vmatprep.mubr.bf16.mxu1 %v652_v43 }
 0x11c   : > { %1152 = vmatmul.mubr.bf16.gmra.mxu1 %v653_v44 }
 0x1a4   : > { %v1125_v27 = vpop.f32.mrf.mxu0 }
 0x1a5   : > { %v768_v46 = vadd.f32 %v1125_v27, %v1362_v45 }
 0x1a6   : > { %v759_v47 = vpop.f32.mrf.mxu0 }
 0x1a7   : > { %888 = vst.msk [vmem:[%s1367_s29 + $0x10] sm:$0xff] %vm364_vm0, %v768_v46  ;;  %v760_v48 = vadd.f32 %v1362_v45, %v759_v47 }
 0x1a8   : > { %v1126_v49 = vpop.f32.mrf.mxu0 }
 0x1a9   : > { %886 = vst.msk [vmem:[%s1367_s29] sm:$0xff] %vm364_vm0, %v760_v48  ;;  %v771_v50 = vadd.f32 %v1126_v49, %v1362_v45 }
 0x1aa   : > { %v762_v51 = vpop.f32.mrf.mxu0 }
 0x1ab   : > { %889 = vst.msk [vmem:[%s1367_s29 + $0x18] sm:$0xff] %vm364_vm0, %v771_v50  ;;  %v763_v52 = vadd.f32 %v1362_v45, %v762_v51 }
 0x1ac   : > { %v1129_v53 = vpop.f32.mrf.mxu1 }
 0x1ad   : > { %887 = vst.msk [vmem:[%s1367_s29 + $0x8] sm:$0xff] %vm364_vm0, %v763_v52  ;;  %v784_v54 = vadd.f32 %v1129_v53, %v1362_v45 }
 0x1ae   : > { %v775_v55 = vpop.f32.mrf.mxu1 }
 0x1af   : > { %892 = vst.msk [vmem:[%s1367_s29 + $0x30] sm:$0xff] %vm364_vm0, %v784_v54  ;;  %v776_v56 = vadd.f32 %v1362_v45, %v775_v55 }
 0x1b0   : > { %v1130_v57 = vpop.f32.mrf.mxu1 }
 0x1b1   : > { %890 = vst.msk [vmem:[%s1367_s29 + $0x20] sm:$0xff] %vm364_vm0, %v776_v56  ;;  %v787_v58 = vadd.f32 %v1130_v57, %v1362_v45 }
 0x1b2   : > { %v778_v59 = vpop.f32.mrf.mxu1 }
 0x1b3   : > { %893 = vst.msk [vmem:[%s1367_s29 + $0x38] sm:$0xff] %vm364_vm0, %v787_v58  ;;  %v779_v60 = vadd.f32 %v1362_v45, %v778_v59 }
 0x1b4   : > { %v1133_v61 = vpop.f32.mrf.mxu1 }
 0x1b5   : > { %891 = vst.msk [vmem:[%s1367_s29 + $0x28] sm:$0xff] %vm364_vm0, %v779_v60  ;;  %v800_v62 = vadd.f32 %v1133_v61, %v1362_v45 }
 0x1b6   : > { %v791_v63 = vpop.f32.mrf.mxu1 }
 0x1b7   : > { %896 = vst.msk [vmem:[%s1367_s29 + $0x50] sm:$0xff] %vm364_vm0, %v800_v62  ;;  %v792_v0 = vadd.f32 %v1362_v45, %v791_v63 }
 0x1b8   : > { %v1134_v1 = vpop.f32.mrf.mxu1 }
 0x1b9   : > { %894 = vst.msk [vmem:[%s1367_s29 + $0x40] sm:$0xff] %vm364_vm0, %v792_v0  ;;  %v803_v2 = vadd.f32 %v1134_v1, %v1362_v45 }
 0x1ba   : > { %v794_v3 = vpop.f32.mrf.mxu1 }
 0x1bb   : > { %897 = vst.msk [vmem:[%s1367_s29 + $0x58] sm:$0xff] %vm364_vm0, %v803_v2  ;;  %v795_v4 = vadd.f32 %v1362_v45, %v794_v3 }
 0x1bc   : > { %v1137_v5 = vpop.f32.mrf.mxu1 }
 0x1bd   : > { %895 = vst.msk [vmem:[%s1367_s29 + $0x48] sm:$0xff] %vm364_vm0, %v795_v4  ;;  %v816_v6 = vadd.f32 %v1137_v5, %v1362_v45 }
 0x1be   : > { %v807_v7 = vpop.f32.mrf.mxu1 }
 0x1bf   : > { %900 = vst.msk [vmem:[%s1367_s29 + $0x70] sm:$0xff] %vm364_vm0, %v816_v6  ;;  %v808_v8 = vadd.f32 %v1362_v45, %v807_v7 }
 0x1c0   : > { %v1138_v9 = vpop.f32.mrf.mxu1 }
 0x1c1   : > { %898 = vst.msk [vmem:[%s1367_s29 + $0x60] sm:$0xff] %vm364_vm0, %v808_v8  ;;  %v819_v10 = vadd.f32 %v1138_v9, %v1362_v45 }
 0x1c2   : > { %v810_v11 = vpop.f32.mrf.mxu1 }
 0x1c3   : > { %901 = vst.msk [vmem:[%s1367_s29 + $0x78] sm:$0xff] %vm364_vm0, %v819_v10  ;;  %v811_v12 = vadd.f32 %v1362_v45, %v810_v11 }
 0x1c4   : > { %v1141_v13 = vpop.f32.mrf.mxu1 }
 0x1c5   : > { %899 = vst.msk [vmem:[%s1367_s29 + $0x68] sm:$0xff] %vm364_vm0, %v811_v12  ;;  %v832_v14 = vadd.f32 %v1141_v13, %v1362_v45 }
 0x1c6   : > { %v823_v15 = vpop.f32.mrf.mxu1 }
 0x1c7   : > { %904 = vst.msk [vmem:[%s1367_s29 + $0x90] sm:$0xff] %vm364_vm0, %v832_v14  ;;  %v824_v16 = vadd.f32 %v1362_v45, %v823_v15 }
 0x1c8   : > { %v1142_v17 = vpop.f32.mrf.mxu1 }
 0x1c9   : > { %902 = vst.msk [vmem:[%s1367_s29 + $0x80] sm:$0xff] %vm364_vm0, %v824_v16  ;;  %v835_v18 = vadd.f32 %v1142_v17, %v1362_v45 }
 0x1ca   : > { %v826_v19 = vpop.f32.mrf.mxu1 }
 0x1cb   : > { %905 = vst.msk [vmem:[%s1367_s29 + $0x98] sm:$0xff] %vm364_vm0, %v835_v18  ;;  %v827_v20 = vadd.f32 %v1362_v45, %v826_v19 }
 0x1cc   : > { %v1145_v21 = vpop.f32.mrf.mxu1 }
 0x1cd   : > { %903 = vst.msk [vmem:[%s1367_s29 + $0x88] sm:$0xff] %vm364_vm0, %v827_v20  ;;  %v848_v22 = vadd.f32 %v1145_v21, %v1362_v45 }
 0x1ce   : > { %v839_v23 = vpop.f32.mrf.mxu1 }
 0x1cf   : > { %908 = vst.msk [vmem:[%s1367_s29 + $0xb0] sm:$0xff] %vm364_vm0, %v848_v22  ;;  %v840_v24 = vadd.f32 %v1362_v45, %v839_v23 }
 0x1d0   : > { %v1146_v25 = vpop.f32.mrf.mxu1 }
 0x1d1   : > { %906 = vst.msk [vmem:[%s1367_s29 + $0xa0] sm:$0xff] %vm364_vm0, %v840_v24  ;;  %v851_v26 = vadd.f32 %v1146_v25, %v1362_v45 }
 0x1d2   : > { %v842_v28 = vpop.f32.mrf.mxu1 }
 0x1d3   : > { %909 = vst.msk [vmem:[%s1367_s29 + $0xb8] sm:$0xff] %vm364_vm0, %v851_v26  ;;  %v843_v29 = vadd.f32 %v1362_v45, %v842_v28 }
 0x1d4   : > { %v1149_v30 = vpop.f32.mrf.mxu1 }
 0x1d5   : > { %907 = vst.msk [vmem:[%s1367_s29 + $0xa8] sm:$0xff] %vm364_vm0, %v843_v29  ;;  %v864_v31 = vadd.f32 %v1149_v30, %v1362_v45 }
 0x1d6   : > { %v855_v32 = vpop.f32.mrf.mxu1 }
 0x1d7   : > { %912 = vst.msk [vmem:[%s1367_s29 + $0xd0] sm:$0xff] %vm364_vm0, %v864_v31  ;;  %v856_v33 = vadd.f32 %v1362_v45, %v855_v32 }
 0x1d8   : > { %v1150_v34 = vpop.f32.mrf.mxu1 }
 0x1d9   : > { %910 = vst.msk [vmem:[%s1367_s29 + $0xc0] sm:$0xff] %vm364_vm0, %v856_v33  ;;  %v867_v35 = vadd.f32 %v1150_v34, %v1362_v45 }
 0x1da   : > { %v858_v36 = vpop.f32.mrf.mxu1 }
 0x1db   : > { %913 = vst.msk [vmem:[%s1367_s29 + $0xd8] sm:$0xff] %vm364_vm0, %v867_v35  ;;  %v859_v37 = vadd.f32 %v1362_v45, %v858_v36 }
 0x1dc   : > { %v1153_v38 = vpop.f32.mrf.mxu1 }
 0x1dd   : > { %911 = vst.msk [vmem:[%s1367_s29 + $0xc8] sm:$0xff] %vm364_vm0, %v859_v37  ;;  %v880_v39 = vadd.f32 %v1153_v38, %v1362_v45 }
 0x1de   : > { %v871_v40 = vpop.f32.mrf.mxu1 }
 0x1df   : > { %916 = vst.msk [vmem:[%s1367_s29 + $0xf0] sm:$0xff] %vm364_vm0, %v880_v39  ;;  %v872_v41 = vadd.f32 %v1362_v45, %v871_v40 }
 0x1e0   : > { %v1154_v42 = vpop.f32.mrf.mxu1 }
 0x1e1   : > { %914 = vst.msk [vmem:[%s1367_s29 + $0xe0] sm:$0xff] %vm364_vm0, %v872_v41  ;;  %v883_v43 = vadd.f32 %v1154_v42, %v1362_v45 }
 0x1e2   : > { %v874_v44 = vpop.f32.mrf.mxu1 }
 0x1e3   : > { %917 = vst.msk [vmem:[%s1367_s29 + $0xf8] sm:$0xff] %vm364_vm0, %v883_v43  ;;  %v875_v27 = vadd.f32 %v1362_v45, %v874_v44 }
 0x1e5   : > { %915 = vst.msk [vmem:[%s1367_s29 + $0xe8] sm:$0xff] %vm364_vm0, %v875_v27 }
 0x1e6 PF: > { %s15_s18 = sadd.s32 1, %s1211_s18  }
 0x1e7   : > { %p12_p4 = scmp.ge.s32.totalorder %s15_s18, 4  }
 0x1e9   :  { %14 = sbr.rel (!%p12_p4) target bundleno = 1 (0x1), region = 70 }

</bundles_post_ra>
